<compile_context>
chip_gen: v7x
topology: tpu7x:2x2x1
jax: 0.10.0
libtpu: 0.0.40
codegen_flags: <defaults>
</compile_context>

<pallas_src>
import functools

import jax
import jax.numpy as jnp
from jax.experimental import pallas as pl
from jax.experimental.pallas import tpu as pltpu

LANES = 128
SUBLANES = 16  # bf16 sublane packing for the batch (second-minor) tile dim


def _round_up(x, m):
    return ((x + m - 1) // m) * m


def _bf16_epilogue_default():
    """bf16 VALU epilogue only on v6e / v7x; f32 elsewhere (v5e has no bf16 VALU)."""
    try:
        kind = jax.devices()[0].device_kind.lower()
    except Exception:
        return False
    return ("v6" in kind) or ("v7" in kind)


def _mlp_kernel(x_ref,
                w1_ref, b1_ref,
                w2_ref, b2_ref,
                w3_ref, b3_ref,
                w4_ref, b4_ref,
                o_ref):
    """Fused fc1->relu->fc2->relu->fc3->relu->fc4 on one batch tile.

    MXU is fed bf16 operands with f32 accumulation.  The elementwise epilogue
    (bias add + ReLU) runs in the bias dtype (f32 on v5e, bf16 on v6e/v7x).
    The output tile is stored bf16 / lane-dense (padded to 128 columns).
    """
    x = x_ref[...].astype(jnp.bfloat16)        # in-kernel cast: f32 HBM -> bf16 MXU

    def layer(h, w_ref, b_ref, relu):
        y = jnp.dot(h, w_ref[...], preferred_element_type=jnp.float32)
        y = y.astype(b_ref.dtype) + b_ref[...]            # epilogue in bias dtype
        if relu:
            y = jnp.maximum(y, 0).astype(jnp.bfloat16)    # bf16 feeds next MXU
        return y

    h = layer(x, w1_ref, b1_ref, relu=True)
    h = layer(h, w2_ref, b2_ref, relu=True)
    h = layer(h, w3_ref, b3_ref, relu=True)
    o = layer(h, w4_ref, b4_ref, relu=False)
    o_ref[...] = o.astype(o_ref.dtype)                    # bf16, full-lane store


@functools.partial(jax.jit, static_argnames=("batch_tile", "bf16_epilogue"))
def dnn128_forward(x, params, *, batch_tile=1024, bf16_epilogue=None):
    """Run the fused MLP kernel, tiling over the batch dimension."""
    (w1, b1), (w2, b2), (w3, b3), (w4, b4) = params
    B, in_len = x.shape
    cls = w4.shape[1]

    if bf16_epilogue is None:
        bf16_epilogue = _bf16_epilogue_default()
    ep_dtype = jnp.bfloat16 if bf16_epilogue else jnp.float32

    # --- lane-dense output: zero-pad the final layer to a multiple of 128 ---
    cls_pad = _round_up(cls, LANES)
    if cls_pad != cls:
        w4 = jnp.pad(w4, ((0, 0), (0, cls_pad - cls)))
        b4 = jnp.pad(b4, ((0, 0), (0, cls_pad - cls)))

    # --- bf16 MXU weights; biases in the epilogue dtype ---
    w1, w2, w3, w4 = (w.astype(jnp.bfloat16) for w in (w1, w2, w3, w4))
    b1, b2, b3, b4 = (b.astype(ep_dtype) for b in (b1, b2, b3, b4))

    x = x.astype(jnp.float32)        # mirrors torch x.float(); bf16 cast in-kernel

    # --- batch tile: big (amortize ~0.35us/step), but keep >=2 grid steps so
    #     dimension_semantics=('parallel',) can use both TCs on v7x.
    bt = min(batch_tile, _round_up(max(pl.cdiv(B, 2), SUBLANES), SUBLANES))
    if B < bt:                        # tiny batch: pad so the tile fits the array
        x = jnp.pad(x, ((0, bt - B), (0, 0)))
    Bk = x.shape[0]
    grid = (pl.cdiv(Bk, bt),)         # ragged last block handled by Pallas masking

    def resident(arr):
        shape = arr.shape
        return pl.BlockSpec(shape, lambda i, _z=(0,) * len(shape): _z)

    h1, h2, h3 = w1.shape[1], w2.shape[1], w3.shape[1]
    flops = 2 * Bk * (in_len * h1 + h1 * h2 + h2 * h3 + h3 * cls_pad)
    bytes_accessed = (Bk * in_len * 4 + Bk * cls_pad * 2
                      + sum(int(a.size) * a.dtype.itemsize
                            for a in (w1, b1, w2, b2, w3, b3, w4, b4)))

    # Weights/biases (~100 KB) stay resident; per-step streamed data is just the
    # f32 x tile + bf16 out tile + fused intermediates, well under the scoped
    # VMEM default up to ~2K-row tiles.  Only raise the limit beyond that (v5e).
    vmem_limit = 96 * 1024 * 1024 if bt > 2048 else None

    out = pl.pallas_call(
        _mlp_kernel,
        out_shape=jax.ShapeDtypeStruct((Bk, cls_pad), jnp.bfloat16),
        grid_spec=pltpu.PrefetchScalarGridSpec(
            num_scalar_prefetch=0,
            grid=grid,
            in_specs=[
                pl.BlockSpec((bt, in_len), lambda i: (i, 0)),   # x tile (f32)
                resident(w1), resident(b1),
                resident(w2), resident(b2),
                resident(w3), resident(b3),
                resident(w4), resident(b4),
            ],
            out_specs=pl.BlockSpec((bt, cls_pad), lambda i: (i, 0)),
        ),
        compiler_params=pltpu.CompilerParams(
            dimension_semantics=("parallel",),        # shards batch across TCs
            vmem_limit_bytes=vmem_limit),
        cost_estimate=pl.CostEstimate(flops=flops, transcendentals=0,
                                      bytes_accessed=bytes_accessed),
    )(x, w1, b1, w2, b2, w3, b3, w4, b4)

    # Single fused slice+cast back to the module's f32 output.
    return out[:B, :cls].astype(jnp.float32)


def init_params(key, input_length, hidden_length, cls_num):
    """Deterministic init mirroring nn.Linear default U(-1/sqrt(in), 1/sqrt(in))."""
    dims = [(input_length, hidden_length),
            (hidden_length, hidden_length),
            (hidden_length, hidden_length),
            (hidden_length, cls_num)]
    params = []
    for fan_in, fan_out in dims:
        key, kw, kb = jax.random.split(key, 3)
        bound = 1.0 / jnp.sqrt(float(fan_in))
        w = jax.random.uniform(kw, (fan_in, fan_out), jnp.float32, -bound, bound)
        b = jax.random.uniform(kb, (1, fan_out), jnp.float32, -bound, bound)
        params.append((w, b))
    return params


def reference_forward_f32(x, params):
    """Plain-JAX f32 reference of the PyTorch forward pass."""
    h = x.astype(jnp.float32)
    for idx, (w, b) in enumerate(params):
        h = h @ w + b
        if idx < len(params) - 1:
            h = jnp.maximum(h, 0.0)
    return h


def reference_forward_mixed(x, params, *, bf16_epilogue):
    """Plain-JAX reference matching the kernel's rounding points exactly."""
    ep = jnp.bfloat16 if bf16_epilogue else jnp.float32
    h = x.astype(jnp.float32).astype(jnp.bfloat16)
    for idx, (w, b) in enumerate(params):
        y = jnp.dot(h, w.astype(jnp.bfloat16),
                    preferred_element_type=jnp.float32)
        y = y.astype(ep) + b.astype(ep)
        if idx < len(params) - 1:
            h = jnp.maximum(y, 0).astype(jnp.bfloat16)
        else:
            return y.astype(jnp.bfloat16).astype(jnp.float32)  # bf16 store path


if __name__ == "__main__":
    # Shapes consistent with DNN128(input_length=32, hidden_length=128, cls_num=10).
    input_length, hidden_length, cls_num = 32, 128, 10

    key = jax.random.PRNGKey(0)
    key, kp = jax.random.split(key)
    params = init_params(kp, input_length, hidden_length, cls_num)

    bf16_ep = _bf16_epilogue_default()

    ok = True
    for batch in (8, 40):   # 40 exercises the 2-step grid + ragged last block
        key, kx = jax.random.split(key)
        x = jax.random.normal(kx, (batch, input_length), jnp.float32)

        out = jax.block_until_ready(dnn128_forward(x, params))
        assert out.shape == (batch, cls_num)

        ref_mixed = reference_forward_mixed(x, params, bf16_epilogue=bf16_ep)
        ref_f32 = reference_forward_f32(x, params)
        # Tight check vs a reference with matching bf16/f32 rounding points.
        ok &= bool(jnp.allclose(out, ref_mixed, atol=2e-2, rtol=2e-2))
        # Loose check vs the pure-f32 PyTorch-equivalent reference.
        ok &= bool(jnp.allclose(out, ref_f32, atol=7e-2, rtol=7e-2))

    assert ok, "mismatch vs reference"
    print("KERNEL_OK")
</pallas_src>

<mosaic_0001>
module attributes {stable_mosaic.version = 11 : i64} {
  func.func @_mlp_kernel(%arg0: i32, %arg1: memref<16x32xf32, #tpu.memory_space<vmem>>, %arg2: memref<32x128xbf16, #tpu.memory_space<vmem>>, %arg3: memref<1x128xf32, #tpu.memory_space<vmem>>, %arg4: memref<128x128xbf16, #tpu.memory_space<vmem>>, %arg5: memref<1x128xf32, #tpu.memory_space<vmem>>, %arg6: memref<128x128xbf16, #tpu.memory_space<vmem>>, %arg7: memref<1x128xf32, #tpu.memory_space<vmem>>, %arg8: memref<128x128xbf16, #tpu.memory_space<vmem>>, %arg9: memref<1x128xf32, #tpu.memory_space<vmem>>, %arg10: memref<16x128xbf16, #tpu.memory_space<vmem>>) attributes {dimension_semantics = [#tpu.dimension_semantics<parallel>], iteration_bounds = array<i64: 1>, scalar_prefetch = 0 : i64, scratch_operands = 0 : i64, tpu.core_type = #tpu.core_type<tc>, window_params = [{transform_indices = @transform_0, window_bounds = array<i64: 16, 32>}, {pipeline_mode = #tpu.pipeline_mode<synchronous>, transform_indices = @transform_1, window_bounds = array<i64: 32, 128>}, {pipeline_mode = #tpu.pipeline_mode<synchronous>, transform_indices = @transform_2, window_bounds = array<i64: 1, 128>}, {pipeline_mode = #tpu.pipeline_mode<synchronous>, transform_indices = @transform_3, window_bounds = array<i64: 128, 128>}, {pipeline_mode = #tpu.pipeline_mode<synchronous>, transform_indices = @transform_4, window_bounds = array<i64: 1, 128>}, {pipeline_mode = #tpu.pipeline_mode<synchronous>, transform_indices = @transform_5, window_bounds = array<i64: 128, 128>}, {pipeline_mode = #tpu.pipeline_mode<synchronous>, transform_indices = @transform_6, window_bounds = array<i64: 1, 128>}, {pipeline_mode = #tpu.pipeline_mode<synchronous>, transform_indices = @transform_7, window_bounds = array<i64: 128, 128>}, {pipeline_mode = #tpu.pipeline_mode<synchronous>, transform_indices = @transform_8, window_bounds = array<i64: 1, 128>}, {transform_indices = @transform_9, window_bounds = array<i64: 16, 128>}]} {
    %c0 = arith.constant 0 : index
    %c0_0 = arith.constant 0 : index
    %0 = vector.load %arg1[%c0, %c0_0] : memref<16x32xf32, #tpu.memory_space<vmem>>, vector<16x32xf32>
    %1 = arith.truncf %0 : vector<16x32xf32> to vector<16x32xbf16>
    %c0_1 = arith.constant 0 : index
    %c0_2 = arith.constant 0 : index
    %2 = vector.load %arg2[%c0_1, %c0_2] : memref<32x128xbf16, #tpu.memory_space<vmem>>, vector<32x128xbf16>
    %cst = arith.constant dense<0.000000e+00> : vector<16x128xf32>
    %3 = tpu.matmul %1, %2, %cst {dimension_numbers = #tpu.dot_dimension_numbers<[1], [0], [0], [1], [0, 0, 1, 1], [], []>} : vector<16x32xbf16>, vector<32x128xbf16>, vector<16x128xf32> -> vector<16x128xf32>
    %c0_3 = arith.constant 0 : index
    %c0_4 = arith.constant 0 : index
    %4 = vector.load %arg3[%c0_3, %c0_4] : memref<1x128xf32, #tpu.memory_space<vmem>>, vector<1x128xf32>
    %5 = vector.broadcast %4 : vector<1x128xf32> to vector<16x128xf32>
    %6 = arith.addf %3, %5 : vector<16x128xf32>
    %cst_5 = arith.constant 0.000000e+00 : f32
    %7 = vector.broadcast %cst_5 : f32 to vector<16x128xf32>
    %8 = arith.maximumf %6, %7 : vector<16x128xf32>
    %9 = arith.truncf %8 : vector<16x128xf32> to vector<16x128xbf16>
    %c0_6 = arith.constant 0 : index
    %c0_7 = arith.constant 0 : index
    %10 = vector.load %arg4[%c0_6, %c0_7] : memref<128x128xbf16, #tpu.memory_space<vmem>>, vector<128x128xbf16>
    %cst_8 = arith.constant dense<0.000000e+00> : vector<16x128xf32>
    %11 = tpu.matmul %9, %10, %cst_8 {dimension_numbers = #tpu.dot_dimension_numbers<[1], [0], [0], [1], [0, 0, 1, 1], [], []>} : vector<16x128xbf16>, vector<128x128xbf16>, vector<16x128xf32> -> vector<16x128xf32>
    %c0_9 = arith.constant 0 : index
    %c0_10 = arith.constant 0 : index
    %12 = vector.load %arg5[%c0_9, %c0_10] : memref<1x128xf32, #tpu.memory_space<vmem>>, vector<1x128xf32>
    %13 = vector.broadcast %12 : vector<1x128xf32> to vector<16x128xf32>
    %14 = arith.addf %11, %13 : vector<16x128xf32>
    %cst_11 = arith.constant 0.000000e+00 : f32
    %15 = vector.broadcast %cst_11 : f32 to vector<16x128xf32>
    %16 = arith.maximumf %14, %15 : vector<16x128xf32>
    %17 = arith.truncf %16 : vector<16x128xf32> to vector<16x128xbf16>
    %c0_12 = arith.constant 0 : index
    %c0_13 = arith.constant 0 : index
    %18 = vector.load %arg6[%c0_12, %c0_13] : memref<128x128xbf16, #tpu.memory_space<vmem>>, vector<128x128xbf16>
    %cst_14 = arith.constant dense<0.000000e+00> : vector<16x128xf32>
    %19 = tpu.matmul %17, %18, %cst_14 {dimension_numbers = #tpu.dot_dimension_numbers<[1], [0], [0], [1], [0, 0, 1, 1], [], []>} : vector<16x128xbf16>, vector<128x128xbf16>, vector<16x128xf32> -> vector<16x128xf32>
    %c0_15 = arith.constant 0 : index
    %c0_16 = arith.constant 0 : index
    %20 = vector.load %arg7[%c0_15, %c0_16] : memref<1x128xf32, #tpu.memory_space<vmem>>, vector<1x128xf32>
    %21 = vector.broadcast %20 : vector<1x128xf32> to vector<16x128xf32>
    %22 = arith.addf %19, %21 : vector<16x128xf32>
    %cst_17 = arith.constant 0.000000e+00 : f32
    %23 = vector.broadcast %cst_17 : f32 to vector<16x128xf32>
    %24 = arith.maximumf %22, %23 : vector<16x128xf32>
    %25 = arith.truncf %24 : vector<16x128xf32> to vector<16x128xbf16>
    %c0_18 = arith.constant 0 : index
    %c0_19 = arith.constant 0 : index
    %26 = vector.load %arg8[%c0_18, %c0_19] : memref<128x128xbf16, #tpu.memory_space<vmem>>, vector<128x128xbf16>
    %cst_20 = arith.constant dense<0.000000e+00> : vector<16x128xf32>
    %27 = tpu.matmul %25, %26, %cst_20 {dimension_numbers = #tpu.dot_dimension_numbers<[1], [0], [0], [1], [0, 0, 1, 1], [], []>} : vector<16x128xbf16>, vector<128x128xbf16>, vector<16x128xf32> -> vector<16x128xf32>
    %c0_21 = arith.constant 0 : index
    %c0_22 = arith.constant 0 : index
    %28 = vector.load %arg9[%c0_21, %c0_22] : memref<1x128xf32, #tpu.memory_space<vmem>>, vector<1x128xf32>
    %29 = vector.broadcast %28 : vector<1x128xf32> to vector<16x128xf32>
    %30 = arith.addf %27, %29 : vector<16x128xf32>
    %31 = arith.truncf %30 : vector<16x128xf32> to vector<16x128xbf16>
    %c0_23 = arith.constant 0 : index
    %c0_24 = arith.constant 0 : index
    %32 = vector.load %arg10[%c0_23, %c0_24] : memref<16x128xbf16, #tpu.memory_space<vmem>>, vector<16x128xbf16>
    tpu.vector_store %arg10[%c0_23, %c0_24], %31 {strides = array<i32>} : memref<16x128xbf16, #tpu.memory_space<vmem>>, vector<16x128xbf16>,
    return
  }
  func.func @transform_0(%arg0: i32) -> (i32, i32) {
    %c0_i32 = arith.constant 0 : i32
    %c0_i32_0 = arith.constant 0 : i32
    return %arg0, %c0_i32 : i32, i32
  }
  func.func @transform_1(%arg0: i32) -> (i32, i32) {
    %c0_i32 = arith.constant 0 : i32
    %c0_i32_0 = arith.constant 0 : i32
    %c0_i32_1 = arith.constant 0 : i32
    return %c0_i32, %c0_i32_0 : i32, i32
  }
  func.func @transform_2(%arg0: i32) -> (i32, i32) {
    %c0_i32 = arith.constant 0 : i32
    %c0_i32_0 = arith.constant 0 : i32
    %c0_i32_1 = arith.constant 0 : i32
    return %c0_i32, %c0_i32_0 : i32, i32
  }
  func.func @transform_3(%arg0: i32) -> (i32, i32) {
    %c0_i32 = arith.constant 0 : i32
    %c0_i32_0 = arith.constant 0 : i32
    %c0_i32_1 = arith.constant 0 : i32
    return %c0_i32, %c0_i32_0 : i32, i32
  }
  func.func @transform_4(%arg0: i32) -> (i32, i32) {
    %c0_i32 = arith.constant 0 : i32
    %c0_i32_0 = arith.constant 0 : i32
    %c0_i32_1 = arith.constant 0 : i32
    return %c0_i32, %c0_i32_0 : i32, i32
  }
  func.func @transform_5(%arg0: i32) -> (i32, i32) {
    %c0_i32 = arith.constant 0 : i32
    %c0_i32_0 = arith.constant 0 : i32
    %c0_i32_1 = arith.constant 0 : i32
    return %c0_i32, %c0_i32_0 : i32, i32
  }
  func.func @transform_6(%arg0: i32) -> (i32, i32) {
    %c0_i32 = arith.constant 0 : i32
    %c0_i32_0 = arith.constant 0 : i32
    %c0_i32_1 = arith.constant 0 : i32
    return %c0_i32, %c0_i32_0 : i32, i32
  }
  func.func @transform_7(%arg0: i32) -> (i32, i32) {
    %c0_i32 = arith.constant 0 : i32
    %c0_i32_0 = arith.constant 0 : i32
    %c0_i32_1 = arith.constant 0 : i32
    return %c0_i32, %c0_i32_0 : i32, i32
  }
  func.func @transform_8(%arg0: i32) -> (i32, i32) {
    %c0_i32 = arith.constant 0 : i32
    %c0_i32_0 = arith.constant 0 : i32
    %c0_i32_1 = arith.constant 0 : i32
    return %c0_i32, %c0_i32_0 : i32, i32
  }
  func.func @transform_9(%arg0: i32) -> (i32, i32) {
    %c0_i32 = arith.constant 0 : i32
    %c0_i32_0 = arith.constant 0 : i32
    return %arg0, %c0_i32 : i32, i32
  }
}

</mosaic_0001>

<bundles_post_ra>
// kernel: dnn128_forward.1
= control target key start
LH: loop header
LB: loop body
LE: loop exit
PB: predicated region body
PF: predicated region fallthrough
CT: control target
= control target key end

     0   :  { %v629_v0 = vmov 0.0   ;;  %vm630_vm0 = vmmov 0   ;;  %vm59_vm1 = vcmask 261120   ;;  %s814_s1 = inlined_call_operand.vmem [shape: bf16[32,128], index: 1, kind: input, shape index: {}]   ;;  %s815_s0 = inlined_call_operand.vmem [shape: f32[16,32], index: 0, kind: input, shape index: {}]   ;;  %s816_s3 = inlined_call_operand.vmem [shape: bf16[128,128], index: 3, kind: input, shape index: {}]   ;;  %s817_s5 = inlined_call_operand.vmem [shape: bf16[128,128], index: 5, kind: input, shape index: {}]   ;;  %s818_s2 = inlined_call_operand.vmem [shape: f32[1,128], index: 2, kind: input, shape index: {}]   ;;  %s819_s7 = inlined_call_operand.vmem [shape: bf16[128,128], index: 7, kind: input, shape index: {}]   ;;  %s820_s4 = inlined_call_operand.vmem [shape: f32[1,128], index: 4, kind: input, shape index: {}]   ;;  %s821_s6 = inlined_call_operand.vmem [shape: f32[1,128], index: 6, kind: input, shape index: {}]   ;;  %s822_s8 = inlined_call_operand.vmem [shape: f32[1,128], index: 8, kind: input, shape index: {}]   ;;  %s823_s9 = inlined_call_operand.vmem [shape: bf16[16,128], index: 9, kind: output, shape index: {}]  }
   0x1   :  { %533 = vmatprep.subr.bf16.mxu0 %v629_v0  ;;  %v603_v1 = vld [vmem:[%s814_s1] sm:$0xff]   ;;  %537 = vmatprep.mubr.msk.bf16.mxu0 %vm630_vm0, %v629_v0  ;;  %v604_v2 = vld [vmem:[%s814_s1 + $0x8] sm:$0xff]   ;;  %v607_v8 = vld [vmem:[%s816_s3 + $0x10] sm:$0xff]  }
   0x2   :  { %541 = vmatprep.subr.bf16.mxu1 %v629_v0  ;;  %557 = vmatprep.mubr.msk.bf16.mxu1 %vm630_vm0, %v629_v0  ;;  %v33_v3 = vld [vmem:[%s815_s0] sm:$0xff]  ;;  %v34_v4 = vld [vmem:[%s815_s0 + $0x8] sm:$0xff]  ;;  %v608_v9 = vld [vmem:[%s816_s3 + $0x18] sm:$0xff]  }
   0x3   :  { %534 = vmatpush3.bf16.msra.mxu0 %v603_v1  ;;  %v605_v5 = vld [vmem:[%s816_s3] sm:$0xff]   ;;  %v35_v6 = vpack.c.bf16 %v34_v4, %v33_v3  ;;  %v606_v7 = vld [vmem:[%s816_s3 + $0x8] sm:$0xff]   ;;  %v611_v12 = vld [vmem:[%s816_s3 + $0x30] sm:$0xff]  }
   0x4   :  { %535 = vmatprep.subr.bf16.mxu0 %v629_v0  ;;  %542 = vmatpush3.bf16.msra.mxu1 %v605_v5  ;;  %v609_v10 = vld [vmem:[%s816_s3 + $0x20] sm:$0xff]   ;;  %v610_v11 = vld [vmem:[%s816_s3 + $0x28] sm:$0xff]   ;;  %v612_v13 = vld [vmem:[%s816_s3 + $0x38] sm:$0xff]  }
   0x5   :  { %543 = vmatprep.subr.bf16.mxu1 %v629_v0  ;;  %v613_v14 = vld [vmem:[%s817_s5] sm:$0xff]   ;;  %v614_v15 = vld [vmem:[%s817_s5 + $0x8] sm:$0xff]   ;;  %v615_v16 = vld [vmem:[%s817_s5 + $0x10] sm:$0xff]  }
   0x6   :  { %v616_v17 = vld [vmem:[%s817_s5 + $0x18] sm:$0xff]   ;;  %v617_v18 = vld [vmem:[%s817_s5 + $0x20] sm:$0xff]   ;;  %v618_v19 = vld [vmem:[%s817_s5 + $0x28] sm:$0xff]  }
   0x7   :  { %536 = vmatpush3.bf16.msra.mxu0 %v604_v2  ;;  %v463_v20 = vld [vmem:[%s818_s2] ss:$0 sm:$0xff]  ;;  %v619_v30 = vld [vmem:[%s817_s5 + $0x30] sm:$0xff]   ;;  %v620_v31 = vld [vmem:[%s817_s5 + $0x38] sm:$0xff]  }
   0x8   :  { %561 = vmatprep.subr.bf16.mxu0 %v629_v0  ;;  %544 = vmatpush3.bf16.msra.mxu1 %v606_v7  ;;  %v621_v32 = vld [vmem:[%s819_s7] sm:$0xff]   ;;  %v622_v33 = vld [vmem:[%s819_s7 + $0x8] sm:$0xff]   ;;  %v623_v34 = vld [vmem:[%s819_s7 + $0x10] sm:$0xff]  }
   0x9   :  { %545 = vmatprep.subr.bf16.mxu1 %v629_v0  ;;  %v624_v35 = vld [vmem:[%s819_s7 + $0x18] sm:$0xff]   ;;  %v625_v36 = vld [vmem:[%s819_s7 + $0x20] sm:$0xff]   ;;  %v626_v37 = vld [vmem:[%s819_s7 + $0x28] sm:$0xff]  }
   0xa   :  { %538 = vmatmul.mubr.msk.bf16.vlgmr.msra.gmra.mrb[0].mxu0 %vm59_vm1, %v35_v6  ;;  %v467_v38 = vld [vmem:[%s820_s4] ss:$0 sm:$0xff]  ;;  %v627_v48 = vld [vmem:[%s819_s7 + $0x30] sm:$0xff]   ;;  %v628_v49 = vld [vmem:[%s819_s7 + $0x38] sm:$0xff]  }
   0xb   :  { %577 = vmatprep.mubr.msk.bf16.mxu0 %vm630_vm0, %v629_v0  ;;  %562 = vmatpush3.bf16.msra.mxu0 %v613_v14  ;;  %v476_v50 = vld [vmem:[%s821_s6] ss:$0 sm:$0xff] }
   0xc   :  { %546 = vmatpush3.bf16.msra.mxu1 %v607_v8  ;;  %563 = vmatprep.subr.bf16.mxu0 %v629_v0  ;;  %v485_v60 = vld [vmem:[%s822_s8] ss:$0 sm:$0xff] }
   0xd   :  { %547 = vmatprep.subr.bf16.mxu1 %v629_v0 }
   0xf   :  { %564 = vmatpush3.bf16.msra.mxu0 %v614_v15 }
  0x10   :  { %548 = vmatpush3.bf16.msra.mxu1 %v608_v9  ;;  %565 = vmatprep.subr.bf16.mxu0 %v629_v0 }
  0x11   :  { %549 = vmatprep.subr.bf16.mxu1 %v629_v0 }
  0x13   :  { %566 = vmatpush3.bf16.msra.mxu0 %v615_v16 }
  0x14   :  { %550 = vmatpush3.bf16.msra.mxu1 %v609_v10  ;;  %567 = vmatprep.subr.bf16.mxu0 %v629_v0 }
  0x15   :  { %551 = vmatprep.subr.bf16.mxu1 %v629_v0 }
  0x17   :  { %568 = vmatpush3.bf16.msra.mxu0 %v616_v17 }
  0x18   :  { %552 = vmatpush3.bf16.msra.mxu1 %v610_v11  ;;  %569 = vmatprep.subr.bf16.mxu0 %v629_v0 }
  0x19   :  { %553 = vmatprep.subr.bf16.mxu1 %v629_v0 }
  0x1b   :  { %570 = vmatpush3.bf16.msra.mxu0 %v617_v18 }
  0x1c   :  { %554 = vmatpush3.bf16.msra.mxu1 %v611_v12  ;;  %571 = vmatprep.subr.bf16.mxu0 %v629_v0 }
  0x1d   :  { %555 = vmatprep.subr.bf16.mxu1 %v629_v0 }
  0x1f   :  { %572 = vmatpush3.bf16.msra.mxu0 %v618_v19 }
  0x20   :  { %556 = vmatpush3.bf16.msra.mxu1 %v612_v13  ;;  %573 = vmatprep.subr.bf16.mxu0 %v629_v0 }
  0x21   :  { %581 = vmatprep.subr.bf16.mxu1 %v629_v0 }
  0x23   :  { %574 = vmatpush3.bf16.msra.mxu0 %v619_v30 }
  0x24   :  { %575 = vmatprep.subr.bf16.mxu0 %v629_v0 }
  0x27   :  { %576 = vmatpush3.bf16.msra.mxu0 %v620_v31 }
  0xdd   :  { %v97_v21 = vpop.f32.mrb[0].mxu0 }
  0xde   :  { %v98_v22 = vadd.f32 %v463_v20, %v97_v21  ;;  %v539_v23 = vpop.f32.mrb[1].mxu0 }
  0xdf   :  { %v100_v24 = vpop.f32.mrb[2].mxu0 }
  0xe0   :  { %v101_v25 = vadd.f32 %v463_v20, %v100_v24  ;;  %v540_v26 = vpop.f32.mrb[3].mxu0  ;;  %v104_v27 = vmax.f32 %v98_v22, 0.0 }
  0xe2   :  { %v105_v28 = vmax.f32 %v101_v25, 0.0 }
  0xe4   :  { %v106_v29 = vpack.c.bf16 %v105_v28, %v104_v27 }
  0xe6   :  { %558 = vmatmul.mubr.bf16.vlgmr.msra.gmra.mrb[0].mxu1 %v106_v29 }
  0xe7   :  { %597 = vmatprep.mubr.msk.bf16.mxu1 %vm630_vm0, %v629_v0  ;;  %582 = vmatpush3.bf16.msra.mxu1 %v621_v32 }
  0xe8   :  { %583 = vmatprep.subr.bf16.mxu1 %v629_v0 }
  0xeb   :  { %584 = vmatpush3.bf16.msra.mxu1 %v622_v33 }
  0xec   :  { %585 = vmatprep.subr.bf16.mxu1 %v629_v0 }
  0xef   :  { %586 = vmatpush3.bf16.msra.mxu1 %v623_v34 }
  0xf0   :  { %587 = vmatprep.subr.bf16.mxu1 %v629_v0 }
  0xf3   :  { %588 = vmatpush3.bf16.msra.mxu1 %v624_v35 }
  0xf4   :  { %589 = vmatprep.subr.bf16.mxu1 %v629_v0 }
  0xf7   :  { %590 = vmatpush3.bf16.msra.mxu1 %v625_v36 }
  0xf8   :  { %591 = vmatprep.subr.bf16.mxu1 %v629_v0 }
  0xfb   :  { %592 = vmatpush3.bf16.msra.mxu1 %v626_v37 }
  0xfc   :  { %593 = vmatprep.subr.bf16.mxu1 %v629_v0 }
  0xff   :  { %594 = vmatpush3.bf16.msra.mxu1 %v627_v48 }
 0x100   :  { %595 = vmatprep.subr.bf16.mxu1 %v629_v0 }
 0x103   :  { %596 = vmatpush3.bf16.msra.mxu1 %v628_v49 }
 0x1b9   :  { %v212_v39 = vpop.f32.mrb[0].mxu1 }
 0x1ba   :  { %v213_v40 = vadd.f32 %v467_v38, %v212_v39  ;;  %v559_v41 = vpop.f32.mrb[1].mxu1 }
 0x1bb   :  { %v215_v42 = vpop.f32.mrb[2].mxu1 }
 0x1bc   :  { %v216_v43 = vadd.f32 %v467_v38, %v215_v42  ;;  %v560_v44 = vpop.f32.mrb[3].mxu1  ;;  %v219_v45 = vmax.f32 %v213_v40, 0.0 }
 0x1be   :  { %v220_v46 = vmax.f32 %v216_v43, 0.0 }
 0x1c0   :  { %v221_v47 = vpack.c.bf16 %v220_v46, %v219_v45 }
 0x1c2   :  { %578 = vmatmul.mubr.bf16.vlgmr.msra.gmra.mrb[4].mxu0 %v221_v47 }
 0x295   :  { %v327_v51 = vpop.f32.mrb[4].mxu0 }
 0x296   :  { %v328_v52 = vadd.f32 %v476_v50, %v327_v51  ;;  %v579_v53 = vpop.f32.mrb[5].mxu0 }
 0x297   :  { %v330_v54 = vpop.f32.mrb[6].mxu0 }
 0x298   :  { %v331_v55 = vadd.f32 %v476_v50, %v330_v54  ;;  %v580_v56 = vpop.f32.mrb[7].mxu0  ;;  %v334_v57 = vmax.f32 %v328_v52, 0.0 }
 0x29a   :  { %v335_v58 = vmax.f32 %v331_v55, 0.0 }
 0x29c   :  { %v336_v59 = vpack.c.bf16 %v335_v58, %v334_v57 }
 0x29e   :  { %598 = vmatmul.mubr.bf16.vlgmr.msra.gmra.mrb[4].mxu1 %v336_v59 }
 0x371   :  { %v442_v61 = vpop.f32.mrb[4].mxu1 }
 0x372   :  { %v599_v62 = vpop.f32.mrb[5].mxu1  ;;  %v443_v0 = vadd.f32 %v485_v60, %v442_v61 }
 0x373   :  { %v445_v63 = vpop.f32.mrb[6].mxu1 }
 0x374   :  { %v446_v1 = vadd.f32 %v485_v60, %v445_v63  ;;  %v600_v2 = vpop.f32.mrb[7].mxu1 }
 0x376   :  { %v501_v3 = vpack.c.bf16 %v446_v1, %v443_v0 }
 0x378   :  { %502 = vst [vmem:[%s823_s9] sm:$0xff] %v501_v3  }

</bundles_post_ra>
